<compile_context>
chip_gen: v6e
topology: v6e:2x2x1
jax: 0.10.0
libtpu: 0.0.40
codegen_flags: <defaults>
</compile_context>

<pallas_src>
import functools

import jax
import jax.numpy as jnp
from jax.experimental import pallas as pl
from jax.experimental.pallas import tpu as pltpu

# ----- config (mirrors config['RNN'] from the reference module) -----
CONFIG = {
    "RNN": {
        "input_size": 16,
        "hidden_size": 32,
        "num_layers": 2,
        "num_classes": 10,
    }
}


# --------------------------- Pallas kernel ---------------------------

def fused_rnn_kernel(*refs, num_layers):
    """Whole network in one kernel invocation.

    refs = (x, [w_ih_t, w_hh_t, bias] * num_layers, fc_w_t, fc_b,   # inputs
            out,                                                    # output
            u_scratch, seq_scratch)                                 # VMEM scratch

    x:      (B, T, I)  batch_first input
    u/seq:  (T, B, H)  time-major VMEM scratches (hoisted projection / layer out)
    out:    (B, C)     logits
    """
    x_ref = refs[0]
    layer_refs = refs[1 : 1 + 3 * num_layers]
    wfc_ref, bfc_ref, out_ref, u_ref, seq_ref = refs[1 + 3 * num_layers:]

    B, T, _ = x_ref.shape
    H = u_ref.shape[-1]

    h = jnp.zeros((B, H), jnp.float32)
    for layer in range(num_layers):
        wih_ref = layer_refs[3 * layer + 0]
        whh_ref = layer_refs[3 * layer + 1]
        b_ref = layer_refs[3 * layer + 2]
        is_last = layer == num_layers - 1

        # ---- Hoisted input projection (+ bias folded in), written time-major.
        # One (T, in) @ (in, H) matmul per batch row, fully off the serial path.
        wih = wih_ref[...]
        bias = b_ref[...]                                       # (1, H), loaded once
        for b in range(B):                                      # static, B is tiny
            inp = x_ref[b] if layer == 0 else seq_ref[:, b, :]  # (T, in_dim)
            u_ref[:, b, :] = (
                jnp.dot(inp, wih, preferred_element_type=jnp.float32) + bias
            )

        # ---- Sequential recurrence: h_t = tanh(U[t] + h_{t-1} @ W_hh^T).
        # Fully unrolled (T static & small); only 1 matmul + tanh per step.
        whh = whh_ref[...]                                      # hoisted weight load
        h = jnp.zeros((B, H), jnp.float32)
        for t in range(T):
            h = jnp.tanh(
                u_ref[t] + jnp.dot(h, whh, preferred_element_type=jnp.float32)
            )
            if not is_last:
                seq_ref[t] = h                                  # feeds next layer

    # ---- FC head on the last timestep's hidden state of the last layer ----
    out_ref[...] = (
        jnp.dot(h, wfc_ref[...], preferred_element_type=jnp.float32)
        + bfc_ref[...]
    ).astype(out_ref.dtype)


# --------------------------- wrapper ---------------------------

@jax.jit
def rnn_forward(params, x_bti):
    """Matches RNN.forward: stacked nn.RNN layers, then fc on the last timestep."""
    B, T, I = x_bti.shape
    layers = params["layers"]
    num_layers = len(layers)
    H = layers[0]["w_hh_t"].shape[0]
    C = params["fc_w_t"].shape[1]

    flat_inputs = [x_bti]
    in_specs = [pl.BlockSpec((B, T, I), lambda i: (0, 0, 0))]
    for layer in layers:
        for name in ("w_ih_t", "w_hh_t", "bias"):
            arr = layer[name]
            flat_inputs.append(arr)
            in_specs.append(pl.BlockSpec(arr.shape, lambda i: (0, 0)))
    for arr in (params["fc_w_t"], params["fc_b"]):
        flat_inputs.append(arr)
        in_specs.append(pl.BlockSpec(arr.shape, lambda i: (0, 0)))

    kernel = functools.partial(fused_rnn_kernel, num_layers=num_layers)
    return pl.pallas_call(
        kernel,
        out_shape=jax.ShapeDtypeStruct((B, C), jnp.float32),
        grid_spec=pltpu.PrefetchScalarGridSpec(
            num_scalar_prefetch=0,
            grid=(1,),                       # single invocation: whole net fused
            in_specs=in_specs,
            out_specs=pl.BlockSpec((B, C), lambda i: (0, 0)),
            scratch_shapes=[
                pltpu.VMEM((T, B, H), jnp.float32),   # hoisted projection U
                pltpu.VMEM((T, B, H), jnp.float32),   # layer output sequence
            ],
        ),
        compiler_params=pltpu.CompilerParams(
            dimension_semantics=("arbitrary",),
        ),
    )(*flat_inputs)


# --------------------------- params & reference ---------------------------

def init_params(key, cfg):
    """Deterministic params following PyTorch's default RNN/Linear init shapes."""
    in_size = cfg["input_size"]
    H = cfg["hidden_size"]
    C = cfg["num_classes"]
    params = {"layers": []}
    for _ in range(cfg["num_layers"]):
        key, k1, k2, k3, k4 = jax.random.split(key, 5)
        bound = 1.0 / jnp.sqrt(H)
        w_ih = jax.random.uniform(k1, (H, in_size), jnp.float32, -bound, bound)
        w_hh = jax.random.uniform(k2, (H, H), jnp.float32, -bound, bound)
        b_ih = jax.random.uniform(k3, (H,), jnp.float32, -bound, bound)
        b_hh = jax.random.uniform(k4, (H,), jnp.float32, -bound, bound)
        params["layers"].append(
            {
                "w_ih_t": w_ih.T,                         # (in, H)
                "w_hh_t": w_hh.T,                         # (H, H)
                "bias": (b_ih + b_hh).reshape(1, H),      # (1, H)
            }
        )
        in_size = H
    key, k1, k2 = jax.random.split(key, 3)
    bound = 1.0 / jnp.sqrt(H)
    w_fc = jax.random.uniform(k1, (C, H), jnp.float32, -bound, bound)
    b_fc = jax.random.uniform(k2, (C,), jnp.float32, -bound, bound)
    params["fc_w_t"] = w_fc.T                             # (H, C)
    params["fc_b"] = b_fc.reshape(1, C)                   # (1, C)
    return params


def rnn_forward_ref(params, x_bti):
    """Pure-JAX reference for correctness checking."""
    x = x_bti
    for layer in params["layers"]:
        B, T, _ = x.shape
        H = layer["w_hh_t"].shape[0]
        u = jnp.einsum("bti,ih->bth", x, layer["w_ih_t"]) + layer["bias"]
        h = jnp.zeros((B, H), jnp.float32)
        outs = []
        for t in range(T):
            h = jnp.tanh(u[:, t, :] + h @ layer["w_hh_t"])
            outs.append(h)
        x = jnp.stack(outs, axis=1)
    return x[:, -1, :] @ params["fc_w_t"] + params["fc_b"]


if __name__ == "__main__":
    cfg = CONFIG["RNN"]
    B, T = 2, 8
    key = jax.random.PRNGKey(0)
    kx, kp = jax.random.split(key)
    x = jax.random.normal(kx, (B, T, cfg["input_size"]), jnp.float32)
    params = init_params(kp, cfg)

    out = rnn_forward(params, x)
    out = jax.block_until_ready(out)

    ref = rnn_forward_ref(params, x)
    assert out.shape == (B, cfg["num_classes"])
    assert jnp.allclose(out, ref, atol=1e-5, rtol=1e-5), "mismatch vs reference"
    print("KERNEL_OK")
</pallas_src>

<mosaic_0001>
module attributes {stable_mosaic.version = 11 : i64} {
  func.func @fused_rnn_kernel(%arg0: i32, %arg1: memref<2x8x16xf32, #tpu.memory_space<vmem>>, %arg2: memref<16x32xf32, #tpu.memory_space<vmem>>, %arg3: memref<32x32xf32, #tpu.memory_space<vmem>>, %arg4: memref<1x32xf32, #tpu.memory_space<vmem>>, %arg5: memref<32x32xf32, #tpu.memory_space<vmem>>, %arg6: memref<32x32xf32, #tpu.memory_space<vmem>>, %arg7: memref<1x32xf32, #tpu.memory_space<vmem>>, %arg8: memref<32x10xf32, #tpu.memory_space<vmem>>, %arg9: memref<1x10xf32, #tpu.memory_space<vmem>>, %arg10: memref<2x10xf32, #tpu.memory_space<vmem>>, %arg11: memref<8x2x32xf32, #tpu.memory_space<vmem>>, %arg12: memref<8x2x32xf32, #tpu.memory_space<vmem>>) attributes {dimension_semantics = [#tpu.dimension_semantics<arbitrary>], iteration_bounds = array<i64: 1>, scalar_prefetch = 0 : i64, scratch_operands = 2 : i64, tpu.core_type = #tpu.core_type<tc>, window_params = [{pipeline_mode = #tpu.pipeline_mode<synchronous>, transform_indices = @transform_0, window_bounds = array<i64: 2, 8, 16>}, {pipeline_mode = #tpu.pipeline_mode<synchronous>, transform_indices = @transform_1, window_bounds = array<i64: 16, 32>}, {pipeline_mode = #tpu.pipeline_mode<synchronous>, transform_indices = @transform_2, window_bounds = array<i64: 32, 32>}, {pipeline_mode = #tpu.pipeline_mode<synchronous>, transform_indices = @transform_3, window_bounds = array<i64: 1, 32>}, {pipeline_mode = #tpu.pipeline_mode<synchronous>, transform_indices = @transform_4, window_bounds = array<i64: 32, 32>}, {pipeline_mode = #tpu.pipeline_mode<synchronous>, transform_indices = @transform_5, window_bounds = array<i64: 32, 32>}, {pipeline_mode = #tpu.pipeline_mode<synchronous>, transform_indices = @transform_6, window_bounds = array<i64: 1, 32>}, {pipeline_mode = #tpu.pipeline_mode<synchronous>, transform_indices = @transform_7, window_bounds = array<i64: 32, 10>}, {pipeline_mode = #tpu.pipeline_mode<synchronous>, transform_indices = @transform_8, window_bounds = array<i64: 1, 10>}, {pipeline_mode = #tpu.pipeline_mode<synchronous>, transform_indices = @transform_9, window_bounds = array<i64: 2, 10>}]} {
    %c0 = arith.constant 0 : index
    %c0_0 = arith.constant 0 : index
    %0 = vector.load %arg2[%c0, %c0_0] : memref<16x32xf32, #tpu.memory_space<vmem>>, vector<16x32xf32>
    %c0_1 = arith.constant 0 : index
    %c0_2 = arith.constant 0 : index
    %1 = vector.load %arg4[%c0_1, %c0_2] : memref<1x32xf32, #tpu.memory_space<vmem>>, vector<1x32xf32>
    %c0_3 = arith.constant 0 : index
    %c0_4 = arith.constant 0 : index
    %c0_5 = arith.constant 0 : index
    %2 = vector.load %arg1[%c0_3, %c0_4, %c0_5] : memref<2x8x16xf32, #tpu.memory_space<vmem>>, vector<1x8x16xf32>
    %3 = vector.shape_cast %2 : vector<1x8x16xf32> to vector<8x16xf32>
    %cst = arith.constant dense<0.000000e+00> : vector<8x32xf32>
    %4 = tpu.matmul %3, %0, %cst {dimension_numbers = #tpu.dot_dimension_numbers<[1], [0], [0], [1], [0, 0, 1, 1], [], []>} : vector<8x16xf32>, vector<16x32xf32>, vector<8x32xf32> -> vector<8x32xf32>
    %5 = vector.broadcast %1 : vector<1x32xf32> to vector<8x32xf32>
    %6 = arith.addf %4, %5 : vector<8x32xf32>
    %c0_6 = arith.constant 0 : index
    %c0_7 = arith.constant 0 : index
    %c0_8 = arith.constant 0 : index
    %7 = vector.load %arg11[%c0_6, %c0_7, %c0_8] : memref<8x2x32xf32, #tpu.memory_space<vmem>>, vector<8x1x32xf32>
    %8 = vector.shape_cast %7 : vector<8x1x32xf32> to vector<8x32xf32>
    %9 = vector.shape_cast %6 : vector<8x32xf32> to vector<8x1x32xf32>
    tpu.vector_store %arg11[%c0_6, %c0_7, %c0_8], %9 {strides = array<i32>} : memref<8x2x32xf32, #tpu.memory_space<vmem>>, vector<8x1x32xf32>,
    %c1 = arith.constant 1 : index
    %c0_9 = arith.constant 0 : index
    %c0_10 = arith.constant 0 : index
    %10 = vector.load %arg1[%c1, %c0_9, %c0_10] : memref<2x8x16xf32, #tpu.memory_space<vmem>>, vector<1x8x16xf32>
    %11 = vector.shape_cast %10 : vector<1x8x16xf32> to vector<8x16xf32>
    %cst_11 = arith.constant dense<0.000000e+00> : vector<8x32xf32>
    %12 = tpu.matmul %11, %0, %cst_11 {dimension_numbers = #tpu.dot_dimension_numbers<[1], [0], [0], [1], [0, 0, 1, 1], [], []>} : vector<8x16xf32>, vector<16x32xf32>, vector<8x32xf32> -> vector<8x32xf32>
    %13 = vector.broadcast %1 : vector<1x32xf32> to vector<8x32xf32>
    %14 = arith.addf %12, %13 : vector<8x32xf32>
    %c0_12 = arith.constant 0 : index
    %c1_13 = arith.constant 1 : index
    %c0_14 = arith.constant 0 : index
    %15 = vector.load %arg11[%c0_12, %c1_13, %c0_14] : memref<8x2x32xf32, #tpu.memory_space<vmem>>, vector<8x1x32xf32>
    %16 = vector.shape_cast %15 : vector<8x1x32xf32> to vector<8x32xf32>
    %17 = vector.shape_cast %14 : vector<8x32xf32> to vector<8x1x32xf32>
    tpu.vector_store %arg11[%c0_12, %c1_13, %c0_14], %17 {strides = array<i32>} : memref<8x2x32xf32, #tpu.memory_space<vmem>>, vector<8x1x32xf32>,
    %c0_15 = arith.constant 0 : index
    %c0_16 = arith.constant 0 : index
    %18 = vector.load %arg3[%c0_15, %c0_16] : memref<32x32xf32, #tpu.memory_space<vmem>>, vector<32x32xf32>
    %cst_17 = arith.constant 0.000000e+00 : f32
    %19 = vector.broadcast %cst_17 : f32 to vector<2x32xf32>
    %c0_18 = arith.constant 0 : index
    %c0_19 = arith.constant 0 : index
    %c0_20 = arith.constant 0 : index
    %20 = vector.load %arg11[%c0_18, %c0_19, %c0_20] : memref<8x2x32xf32, #tpu.memory_space<vmem>>, vector<1x2x32xf32>
    %21 = vector.shape_cast %20 : vector<1x2x32xf32> to vector<2x32xf32>
    %cst_21 = arith.constant dense<0.000000e+00> : vector<2x32xf32>
    %22 = tpu.matmul %19, %18, %cst_21 {dimension_numbers = #tpu.dot_dimension_numbers<[1], [0], [0], [1], [0, 0, 1, 1], [], []>} : vector<2x32xf32>, vector<32x32xf32>, vector<2x32xf32> -> vector<2x32xf32>
    %23 = arith.addf %21, %22 : vector<2x32xf32>
    %24 = math.tanh %23 : vector<2x32xf32>
    %c0_22 = arith.constant 0 : index
    %c0_23 = arith.constant 0 : index
    %c0_24 = arith.constant 0 : index
    %25 = vector.load %arg12[%c0_22, %c0_23, %c0_24] : memref<8x2x32xf32, #tpu.memory_space<vmem>>, vector<1x2x32xf32>
    %26 = vector.shape_cast %25 : vector<1x2x32xf32> to vector<2x32xf32>
    %27 = vector.shape_cast %24 : vector<2x32xf32> to vector<1x2x32xf32>
    tpu.vector_store %arg12[%c0_22, %c0_23, %c0_24], %27 {strides = array<i32>} : memref<8x2x32xf32, #tpu.memory_space<vmem>>, vector<1x2x32xf32>,
    %c1_25 = arith.constant 1 : index
    %c0_26 = arith.constant 0 : index
    %c0_27 = arith.constant 0 : index
    %28 = vector.load %arg11[%c1_25, %c0_26, %c0_27] : memref<8x2x32xf32, #tpu.memory_space<vmem>>, vector<1x2x32xf32>
    %29 = vector.shape_cast %28 : vector<1x2x32xf32> to vector<2x32xf32>
    %cst_28 = arith.constant dense<0.000000e+00> : vector<2x32xf32>
    %30 = tpu.matmul %24, %18, %cst_28 {dimension_numbers = #tpu.dot_dimension_numbers<[1], [0], [0], [1], [0, 0, 1, 1], [], []>} : vector<2x32xf32>, vector<32x32xf32>, vector<2x32xf32> -> vector<2x32xf32>
    %31 = arith.addf %29, %30 : vector<2x32xf32>
    %32 = math.tanh %31 : vector<2x32xf32>
    %c1_29 = arith.constant 1 : index
    %c0_30 = arith.constant 0 : index
    %c0_31 = arith.constant 0 : index
    %33 = vector.load %arg12[%c1_29, %c0_30, %c0_31] : memref<8x2x32xf32, #tpu.memory_space<vmem>>, vector<1x2x32xf32>
    %34 = vector.shape_cast %33 : vector<1x2x32xf32> to vector<2x32xf32>
    %35 = vector.shape_cast %32 : vector<2x32xf32> to vector<1x2x32xf32>
    tpu.vector_store %arg12[%c1_29, %c0_30, %c0_31], %35 {strides = array<i32>} : memref<8x2x32xf32, #tpu.memory_space<vmem>>, vector<1x2x32xf32>,
    %c2 = arith.constant 2 : index
    %c0_32 = arith.constant 0 : index
    %c0_33 = arith.constant 0 : index
    %36 = vector.load %arg11[%c2, %c0_32, %c0_33] : memref<8x2x32xf32, #tpu.memory_space<vmem>>, vector<1x2x32xf32>
    %37 = vector.shape_cast %36 : vector<1x2x32xf32> to vector<2x32xf32>
    %cst_34 = arith.constant dense<0.000000e+00> : vector<2x32xf32>
    %38 = tpu.matmul %32, %18, %cst_34 {dimension_numbers = #tpu.dot_dimension_numbers<[1], [0], [0], [1], [0, 0, 1, 1], [], []>} : vector<2x32xf32>, vector<32x32xf32>, vector<2x32xf32> -> vector<2x32xf32>
    %39 = arith.addf %37, %38 : vector<2x32xf32>
    %40 = math.tanh %39 : vector<2x32xf32>
    %c2_35 = arith.constant 2 : index
    %c0_36 = arith.constant 0 : index
    %c0_37 = arith.constant 0 : index
    %41 = vector.load %arg12[%c2_35, %c0_36, %c0_37] : memref<8x2x32xf32, #tpu.memory_space<vmem>>, vector<1x2x32xf32>
    %42 = vector.shape_cast %41 : vector<1x2x32xf32> to vector<2x32xf32>
    %43 = vector.shape_cast %40 : vector<2x32xf32> to vector<1x2x32xf32>
    tpu.vector_store %arg12[%c2_35, %c0_36, %c0_37], %43 {strides = array<i32>} : memref<8x2x32xf32, #tpu.memory_space<vmem>>, vector<1x2x32xf32>,
    %c3 = arith.constant 3 : index
    %c0_38 = arith.constant 0 : index
    %c0_39 = arith.constant 0 : index
    %44 = vector.load %arg11[%c3, %c0_38, %c0_39] : memref<8x2x32xf32, #tpu.memory_space<vmem>>, vector<1x2x32xf32>
    %45 = vector.shape_cast %44 : vector<1x2x32xf32> to vector<2x32xf32>
    %cst_40 = arith.constant dense<0.000000e+00> : vector<2x32xf32>
    %46 = tpu.matmul %40, %18, %cst_40 {dimension_numbers = #tpu.dot_dimension_numbers<[1], [0], [0], [1], [0, 0, 1, 1], [], []>} : vector<2x32xf32>, vector<32x32xf32>, vector<2x32xf32> -> vector<2x32xf32>
    %47 = arith.addf %45, %46 : vector<2x32xf32>
    %48 = math.tanh %47 : vector<2x32xf32>
    %c3_41 = arith.constant 3 : index
    %c0_42 = arith.constant 0 : index
    %c0_43 = arith.constant 0 : index
    %49 = vector.load %arg12[%c3_41, %c0_42, %c0_43] : memref<8x2x32xf32, #tpu.memory_space<vmem>>, vector<1x2x32xf32>
    %50 = vector.shape_cast %49 : vector<1x2x32xf32> to vector<2x32xf32>
    %51 = vector.shape_cast %48 : vector<2x32xf32> to vector<1x2x32xf32>
    tpu.vector_store %arg12[%c3_41, %c0_42, %c0_43], %51 {strides = array<i32>} : memref<8x2x32xf32, #tpu.memory_space<vmem>>, vector<1x2x32xf32>,
    %c4 = arith.constant 4 : index
    %c0_44 = arith.constant 0 : index
    %c0_45 = arith.constant 0 : index
    %52 = vector.load %arg11[%c4, %c0_44, %c0_45] : memref<8x2x32xf32, #tpu.memory_space<vmem>>, vector<1x2x32xf32>
    %53 = vector.shape_cast %52 : vector<1x2x32xf32> to vector<2x32xf32>
    %cst_46 = arith.constant dense<0.000000e+00> : vector<2x32xf32>
    %54 = tpu.matmul %48, %18, %cst_46 {dimension_numbers = #tpu.dot_dimension_numbers<[1], [0], [0], [1], [0, 0, 1, 1], [], []>} : vector<2x32xf32>, vector<32x32xf32>, vector<2x32xf32> -> vector<2x32xf32>
    %55 = arith.addf %53, %54 : vector<2x32xf32>
    %56 = math.tanh %55 : vector<2x32xf32>
    %c4_47 = arith.constant 4 : index
    %c0_48 = arith.constant 0 : index
    %c0_49 = arith.constant 0 : index
    %57 = vector.load %arg12[%c4_47, %c0_48, %c0_49] : memref<8x2x32xf32, #tpu.memory_space<vmem>>, vector<1x2x32xf32>
    %58 = vector.shape_cast %57 : vector<1x2x32xf32> to vector<2x32xf32>
    %59 = vector.shape_cast %56 : vector<2x32xf32> to vector<1x2x32xf32>
    tpu.vector_store %arg12[%c4_47, %c0_48, %c0_49], %59 {strides = array<i32>} : memref<8x2x32xf32, #tpu.memory_space<vmem>>, vector<1x2x32xf32>,
    %c5 = arith.constant 5 : index
    %c0_50 = arith.constant 0 : index
    %c0_51 = arith.constant 0 : index
    %60 = vector.load %arg11[%c5, %c0_50, %c0_51] : memref<8x2x32xf32, #tpu.memory_space<vmem>>, vector<1x2x32xf32>
    %61 = vector.shape_cast %60 : vector<1x2x32xf32> to vector<2x32xf32>
    %cst_52 = arith.constant dense<0.000000e+00> : vector<2x32xf32>
    %62 = tpu.matmul %56, %18, %cst_52 {dimension_numbers = #tpu.dot_dimension_numbers<[1], [0], [0], [1], [0, 0, 1, 1], [], []>} : vector<2x32xf32>, vector<32x32xf32>, vector<2x32xf32> -> vector<2x32xf32>
    %63 = arith.addf %61, %62 : vector<2x32xf32>
    %64 = math.tanh %63 : vector<2x32xf32>
    %c5_53 = arith.constant 5 : index
    %c0_54 = arith.constant 0 : index
    %c0_55 = arith.constant 0 : index
    %65 = vector.load %arg12[%c5_53, %c0_54, %c0_55] : memref<8x2x32xf32, #tpu.memory_space<vmem>>, vector<1x2x32xf32>
    %66 = vector.shape_cast %65 : vector<1x2x32xf32> to vector<2x32xf32>
    %67 = vector.shape_cast %64 : vector<2x32xf32> to vector<1x2x32xf32>
    tpu.vector_store %arg12[%c5_53, %c0_54, %c0_55], %67 {strides = array<i32>} : memref<8x2x32xf32, #tpu.memory_space<vmem>>, vector<1x2x32xf32>,
    %c6 = arith.constant 6 : index
    %c0_56 = arith.constant 0 : index
    %c0_57 = arith.constant 0 : index
    %68 = vector.load %arg11[%c6, %c0_56, %c0_57] : memref<8x2x32xf32, #tpu.memory_space<vmem>>, vector<1x2x32xf32>
    %69 = vector.shape_cast %68 : vector<1x2x32xf32> to vector<2x32xf32>
    %cst_58 = arith.constant dense<0.000000e+00> : vector<2x32xf32>
    %70 = tpu.matmul %64, %18, %cst_58 {dimension_numbers = #tpu.dot_dimension_numbers<[1], [0], [0], [1], [0, 0, 1, 1], [], []>} : vector<2x32xf32>, vector<32x32xf32>, vector<2x32xf32> -> vector<2x32xf32>
    %71 = arith.addf %69, %70 : vector<2x32xf32>
    %72 = math.tanh %71 : vector<2x32xf32>
    %c6_59 = arith.constant 6 : index
    %c0_60 = arith.constant 0 : index
    %c0_61 = arith.constant 0 : index
    %73 = vector.load %arg12[%c6_59, %c0_60, %c0_61] : memref<8x2x32xf32, #tpu.memory_space<vmem>>, vector<1x2x32xf32>
    %74 = vector.shape_cast %73 : vector<1x2x32xf32> to vector<2x32xf32>
    %75 = vector.shape_cast %72 : vector<2x32xf32> to vector<1x2x32xf32>
    tpu.vector_store %arg12[%c6_59, %c0_60, %c0_61], %75 {strides = array<i32>} : memref<8x2x32xf32, #tpu.memory_space<vmem>>, vector<1x2x32xf32>,
    %c7 = arith.constant 7 : index
    %c0_62 = arith.constant 0 : index
    %c0_63 = arith.constant 0 : index
    %76 = vector.load %arg11[%c7, %c0_62, %c0_63] : memref<8x2x32xf32, #tpu.memory_space<vmem>>, vector<1x2x32xf32>
    %77 = vector.shape_cast %76 : vector<1x2x32xf32> to vector<2x32xf32>
    %cst_64 = arith.constant dense<0.000000e+00> : vector<2x32xf32>
    %78 = tpu.matmul %72, %18, %cst_64 {dimension_numbers = #tpu.dot_dimension_numbers<[1], [0], [0], [1], [0, 0, 1, 1], [], []>} : vector<2x32xf32>, vector<32x32xf32>, vector<2x32xf32> -> vector<2x32xf32>
    %79 = arith.addf %77, %78 : vector<2x32xf32>
    %80 = math.tanh %79 : vector<2x32xf32>
    %c7_65 = arith.constant 7 : index
    %c0_66 = arith.constant 0 : index
    %c0_67 = arith.constant 0 : index
    %81 = vector.load %arg12[%c7_65, %c0_66, %c0_67] : memref<8x2x32xf32, #tpu.memory_space<vmem>>, vector<1x2x32xf32>
    %82 = vector.shape_cast %81 : vector<1x2x32xf32> to vector<2x32xf32>
    %83 = vector.shape_cast %80 : vector<2x32xf32> to vector<1x2x32xf32>
    tpu.vector_store %arg12[%c7_65, %c0_66, %c0_67], %83 {strides = array<i32>} : memref<8x2x32xf32, #tpu.memory_space<vmem>>, vector<1x2x32xf32>,
    %c0_68 = arith.constant 0 : index
    %c0_69 = arith.constant 0 : index
    %84 = vector.load %arg5[%c0_68, %c0_69] : memref<32x32xf32, #tpu.memory_space<vmem>>, vector<32x32xf32>
    %c0_70 = arith.constant 0 : index
    %c0_71 = arith.constant 0 : index
    %85 = vector.load %arg7[%c0_70, %c0_71] : memref<1x32xf32, #tpu.memory_space<vmem>>, vector<1x32xf32>
    %c0_72 = arith.constant 0 : index
    %c0_73 = arith.constant 0 : index
    %c0_74 = arith.constant 0 : index
    %86 = vector.load %arg12[%c0_72, %c0_73, %c0_74] : memref<8x2x32xf32, #tpu.memory_space<vmem>>, vector<8x1x32xf32>
    %87 = vector.shape_cast %86 : vector<8x1x32xf32> to vector<8x32xf32>
    %cst_75 = arith.constant dense<0.000000e+00> : vector<8x32xf32>
    %88 = tpu.matmul %87, %84, %cst_75 {dimension_numbers = #tpu.dot_dimension_numbers<[1], [0], [0], [1], [0, 0, 1, 1], [], []>} : vector<8x32xf32>, vector<32x32xf32>, vector<8x32xf32> -> vector<8x32xf32>
    %89 = vector.broadcast %85 : vector<1x32xf32> to vector<8x32xf32>
    %90 = arith.addf %88, %89 : vector<8x32xf32>
    %c0_76 = arith.constant 0 : index
    %c0_77 = arith.constant 0 : index
    %c0_78 = arith.constant 0 : index
    %91 = vector.load %arg11[%c0_76, %c0_77, %c0_78] : memref<8x2x32xf32, #tpu.memory_space<vmem>>, vector<8x1x32xf32>
    %92 = vector.shape_cast %91 : vector<8x1x32xf32> to vector<8x32xf32>
    %93 = vector.shape_cast %90 : vector<8x32xf32> to vector<8x1x32xf32>
    tpu.vector_store %arg11[%c0_76, %c0_77, %c0_78], %93 {strides = array<i32>} : memref<8x2x32xf32, #tpu.memory_space<vmem>>, vector<8x1x32xf32>,
    %c0_79 = arith.constant 0 : index
    %c1_80 = arith.constant 1 : index
    %c0_81 = arith.constant 0 : index
    %94 = vector.load %arg12[%c0_79, %c1_80, %c0_81] : memref<8x2x32xf32, #tpu.memory_space<vmem>>, vector<8x1x32xf32>
    %95 = vector.shape_cast %94 : vector<8x1x32xf32> to vector<8x32xf32>
    %cst_82 = arith.constant dense<0.000000e+00> : vector<8x32xf32>
    %96 = tpu.matmul %95, %84, %cst_82 {dimension_numbers = #tpu.dot_dimension_numbers<[1], [0], [0], [1], [0, 0, 1, 1], [], []>} : vector<8x32xf32>, vector<32x32xf32>, vector<8x32xf32> -> vector<8x32xf32>
    %97 = vector.broadcast %85 : vector<1x32xf32> to vector<8x32xf32>
    %98 = arith.addf %96, %97 : vector<8x32xf32>
    %c0_83 = arith.constant 0 : index
    %c1_84 = arith.constant 1 : index
    %c0_85 = arith.constant 0 : index
    %99 = vector.load %arg11[%c0_83, %c1_84, %c0_85] : memref<8x2x32xf32, #tpu.memory_space<vmem>>, vector<8x1x32xf32>
    %100 = vector.shape_cast %99 : vector<8x1x32xf32> to vector<8x32xf32>
    %101 = vector.shape_cast %98 : vector<8x32xf32> to vector<8x1x32xf32>
    tpu.vector_store %arg11[%c0_83, %c1_84, %c0_85], %101 {strides = array<i32>} : memref<8x2x32xf32, #tpu.memory_space<vmem>>, vector<8x1x32xf32>,
    %c0_86 = arith.constant 0 : index
    %c0_87 = arith.constant 0 : index
    %102 = vector.load %arg6[%c0_86, %c0_87] : memref<32x32xf32, #tpu.memory_space<vmem>>, vector<32x32xf32>
    %cst_88 = arith.constant 0.000000e+00 : f32
    %103 = vector.broadcast %cst_88 : f32 to vector<2x32xf32>
    %c0_89 = arith.constant 0 : index
    %c0_90 = arith.constant 0 : index
    %c0_91 = arith.constant 0 : index
    %104 = vector.load %arg11[%c0_89, %c0_90, %c0_91] : memref<8x2x32xf32, #tpu.memory_space<vmem>>, vector<1x2x32xf32>
    %105 = vector.shape_cast %104 : vector<1x2x32xf32> to vector<2x32xf32>
    %cst_92 = arith.constant dense<0.000000e+00> : vector<2x32xf32>
    %106 = tpu.matmul %103, %102, %cst_92 {dimension_numbers = #tpu.dot_dimension_numbers<[1], [0], [0], [1], [0, 0, 1, 1], [], []>} : vector<2x32xf32>, vector<32x32xf32>, vector<2x32xf32> -> vector<2x32xf32>
    %107 = arith.addf %105, %106 : vector<2x32xf32>
    %108 = math.tanh %107 : vector<2x32xf32>
    %c1_93 = arith.constant 1 : index
    %c0_94 = arith.constant 0 : index
    %c0_95 = arith.constant 0 : index
    %109 = vector.load %arg11[%c1_93, %c0_94, %c0_95] : memref<8x2x32xf32, #tpu.memory_space<vmem>>, vector<1x2x32xf32>
    %110 = vector.shape_cast %109 : vector<1x2x32xf32> to vector<2x32xf32>
    %cst_96 = arith.constant dense<0.000000e+00> : vector<2x32xf32>
    %111 = tpu.matmul %108, %102, %cst_96 {dimension_numbers = #tpu.dot_dimension_numbers<[1], [0], [0], [1], [0, 0, 1, 1], [], []>} : vector<2x32xf32>, vector<32x32xf32>, vector<2x32xf32> -> vector<2x32xf32>
    %112 = arith.addf %110, %111 : vector<2x32xf32>
    %113 = math.tanh %112 : vector<2x32xf32>
    %c2_97 = arith.constant 2 : index
    %c0_98 = arith.constant 0 : index
    %c0_99 = arith.constant 0 : index
    %114 = vector.load %arg11[%c2_97, %c0_98, %c0_99] : memref<8x2x32xf32, #tpu.memory_space<vmem>>, vector<1x2x32xf32>
    %115 = vector.shape_cast %114 : vector<1x2x32xf32> to vector<2x32xf32>
    %cst_100 = arith.constant dense<0.000000e+00> : vector<2x32xf32>
    %116 = tpu.matmul %113, %102, %cst_100 {dimension_numbers = #tpu.dot_dimension_numbers<[1], [0], [0], [1], [0, 0, 1, 1], [], []>} : vector<2x32xf32>, vector<32x32xf32>, vector<2x32xf32> -> vector<2x32xf32>
    %117 = arith.addf %115, %116 : vector<2x32xf32>
    %118 = math.tanh %117 : vector<2x32xf32>
    %c3_101 = arith.constant 3 : index
    %c0_102 = arith.constant 0 : index
    %c0_103 = arith.constant 0 : index
    %119 = vector.load %arg11[%c3_101, %c0_102, %c0_103] : memref<8x2x32xf32, #tpu.memory_space<vmem>>, vector<1x2x32xf32>
    %120 = vector.shape_cast %119 : vector<1x2x32xf32> to vector<2x32xf32>
    %cst_104 = arith.constant dense<0.000000e+00> : vector<2x32xf32>
    %121 = tpu.matmul %118, %102, %cst_104 {dimension_numbers = #tpu.dot_dimension_numbers<[1], [0], [0], [1], [0, 0, 1, 1], [], []>} : vector<2x32xf32>, vector<32x32xf32>, vector<2x32xf32> -> vector<2x32xf32>
    %122 = arith.addf %120, %121 : vector<2x32xf32>
    %123 = math.tanh %122 : vector<2x32xf32>
    %c4_105 = arith.constant 4 : index
    %c0_106 = arith.constant 0 : index
    %c0_107 = arith.constant 0 : index
    %124 = vector.load %arg11[%c4_105, %c0_106, %c0_107] : memref<8x2x32xf32, #tpu.memory_space<vmem>>, vector<1x2x32xf32>
    %125 = vector.shape_cast %124 : vector<1x2x32xf32> to vector<2x32xf32>
    %cst_108 = arith.constant dense<0.000000e+00> : vector<2x32xf32>
    %126 = tpu.matmul %123, %102, %cst_108 {dimension_numbers = #tpu.dot_dimension_numbers<[1], [0], [0], [1], [0, 0, 1, 1], [], []>} : vector<2x32xf32>, vector<32x32xf32>, vector<2x32xf32> -> vector<2x32xf32>
    %127 = arith.addf %125, %126 : vector<2x32xf32>
    %128 = math.tanh %127 : vector<2x32xf32>
    %c5_109 = arith.constant 5 : index
    %c0_110 = arith.constant 0 : index
    %c0_111 = arith.constant 0 : index
    %129 = vector.load %arg11[%c5_109, %c0_110, %c0_111] : memref<8x2x32xf32, #tpu.memory_space<vmem>>, vector<1x2x32xf32>
    %130 = vector.shape_cast %129 : vector<1x2x32xf32> to vector<2x32xf32>
    %cst_112 = arith.constant dense<0.000000e+00> : vector<2x32xf32>
    %131 = tpu.matmul %128, %102, %cst_112 {dimension_numbers = #tpu.dot_dimension_numbers<[1], [0], [0], [1], [0, 0, 1, 1], [], []>} : vector<2x32xf32>, vector<32x32xf32>, vector<2x32xf32> -> vector<2x32xf32>
    %132 = arith.addf %130, %131 : vector<2x32xf32>
    %133 = math.tanh %132 : vector<2x32xf32>
    %c6_113 = arith.constant 6 : index
    %c0_114 = arith.constant 0 : index
    %c0_115 = arith.constant 0 : index
    %134 = vector.load %arg11[%c6_113, %c0_114, %c0_115] : memref<8x2x32xf32, #tpu.memory_space<vmem>>, vector<1x2x32xf32>
    %135 = vector.shape_cast %134 : vector<1x2x32xf32> to vector<2x32xf32>
    %cst_116 = arith.constant dense<0.000000e+00> : vector<2x32xf32>
    %136 = tpu.matmul %133, %102, %cst_116 {dimension_numbers = #tpu.dot_dimension_numbers<[1], [0], [0], [1], [0, 0, 1, 1], [], []>} : vector<2x32xf32>, vector<32x32xf32>, vector<2x32xf32> -> vector<2x32xf32>
    %137 = arith.addf %135, %136 : vector<2x32xf32>
    %138 = math.tanh %137 : vector<2x32xf32>
    %c7_117 = arith.constant 7 : index
    %c0_118 = arith.constant 0 : index
    %c0_119 = arith.constant 0 : index
    %139 = vector.load %arg11[%c7_117, %c0_118, %c0_119] : memref<8x2x32xf32, #tpu.memory_space<vmem>>, vector<1x2x32xf32>
    %140 = vector.shape_cast %139 : vector<1x2x32xf32> to vector<2x32xf32>
    %cst_120 = arith.constant dense<0.000000e+00> : vector<2x32xf32>
    %141 = tpu.matmul %138, %102, %cst_120 {dimension_numbers = #tpu.dot_dimension_numbers<[1], [0], [0], [1], [0, 0, 1, 1], [], []>} : vector<2x32xf32>, vector<32x32xf32>, vector<2x32xf32> -> vector<2x32xf32>
    %142 = arith.addf %140, %141 : vector<2x32xf32>
    %143 = math.tanh %142 : vector<2x32xf32>
    %c0_121 = arith.constant 0 : index
    %c0_122 = arith.constant 0 : index
    %144 = vector.load %arg8[%c0_121, %c0_122] : memref<32x10xf32, #tpu.memory_space<vmem>>, vector<32x10xf32>
    %cst_123 = arith.constant dense<0.000000e+00> : vector<2x10xf32>
    %145 = tpu.matmul %143, %144, %cst_123 {dimension_numbers = #tpu.dot_dimension_numbers<[1], [0], [0], [1], [0, 0, 1, 1], [], []>} : vector<2x32xf32>, vector<32x10xf32>, vector<2x10xf32> -> vector<2x10xf32>
    %c0_124 = arith.constant 0 : index
    %c0_125 = arith.constant 0 : index
    %146 = vector.load %arg9[%c0_124, %c0_125] : memref<1x10xf32, #tpu.memory_space<vmem>>, vector<1x10xf32>
    %147 = vector.broadcast %146 : vector<1x10xf32> to vector<2x10xf32>
    %148 = arith.addf %145, %147 : vector<2x10xf32>
    %c0_126 = arith.constant 0 : index
    %c0_127 = arith.constant 0 : index
    %149 = vector.load %arg10[%c0_126, %c0_127] : memref<2x10xf32, #tpu.memory_space<vmem>>, vector<2x10xf32>
    tpu.vector_store %arg10[%c0_126, %c0_127], %148 {strides = array<i32>} : memref<2x10xf32, #tpu.memory_space<vmem>>, vector<2x10xf32>,
    return
  }
  func.func @transform_0(%arg0: i32) -> (i32, i32, i32) {
    %c0_i32 = arith.constant 0 : i32
    %c0_i32_0 = arith.constant 0 : i32
    %c0_i32_1 = arith.constant 0 : i32
    %c0_i32_2 = arith.constant 0 : i32
    return %c0_i32, %c0_i32_0, %c0_i32_1 : i32, i32, i32
  }
  func.func @transform_1(%arg0: i32) -> (i32, i32) {
    %c0_i32 = arith.constant 0 : i32
    %c0_i32_0 = arith.constant 0 : i32
    %c0_i32_1 = arith.constant 0 : i32
    return %c0_i32, %c0_i32_0 : i32, i32
  }
  func.func @transform_2(%arg0: i32) -> (i32, i32) {
    %c0_i32 = arith.constant 0 : i32
    %c0_i32_0 = arith.constant 0 : i32
    %c0_i32_1 = arith.constant 0 : i32
    return %c0_i32, %c0_i32_0 : i32, i32
  }
  func.func @transform_3(%arg0: i32) -> (i32, i32) {
    %c0_i32 = arith.constant 0 : i32
    %c0_i32_0 = arith.constant 0 : i32
    %c0_i32_1 = arith.constant 0 : i32
    return %c0_i32, %c0_i32_0 : i32, i32
  }
  func.func @transform_4(%arg0: i32) -> (i32, i32) {
    %c0_i32 = arith.constant 0 : i32
    %c0_i32_0 = arith.constant 0 : i32
    %c0_i32_1 = arith.constant 0 : i32
    return %c0_i32, %c0_i32_0 : i32, i32
  }
  func.func @transform_5(%arg0: i32) -> (i32, i32) {
    %c0_i32 = arith.constant 0 : i32
    %c0_i32_0 = arith.constant 0 : i32
    %c0_i32_1 = arith.constant 0 : i32
    return %c0_i32, %c0_i32_0 : i32, i32
  }
  func.func @transform_6(%arg0: i32) -> (i32, i32) {
    %c0_i32 = arith.constant 0 : i32
    %c0_i32_0 = arith.constant 0 : i32
    %c0_i32_1 = arith.constant 0 : i32
    return %c0_i32, %c0_i32_0 : i32, i32
  }
  func.func @transform_7(%arg0: i32) -> (i32, i32) {
    %c0_i32 = arith.constant 0 : i32
    %c0_i32_0 = arith.constant 0 : i32
    %c0_i32_1 = arith.constant 0 : i32
    return %c0_i32, %c0_i32_0 : i32, i32
  }
  func.func @transform_8(%arg0: i32) -> (i32, i32) {
    %c0_i32 = arith.constant 0 : i32
    %c0_i32_0 = arith.constant 0 : i32
    %c0_i32_1 = arith.constant 0 : i32
    return %c0_i32, %c0_i32_0 : i32, i32
  }
  func.func @transform_9(%arg0: i32) -> (i32, i32) {
    %c0_i32 = arith.constant 0 : i32
    %c0_i32_0 = arith.constant 0 : i32
    %c0_i32_1 = arith.constant 0 : i32
    return %c0_i32, %c0_i32_0 : i32, i32
  }
}

</mosaic_0001>

<bundles_post_ra>
// kernel: rnn_forward.1
= control target key start
LH: loop header
LB: loop body
LE: loop exit
PB: predicated region body
PF: predicated region fallthrough
CT: control target
= control target key end

     0   :  { %14 = vsyncpa [#allocation5], 0  ;;  %s2944_s0 = inlined_call_operand.vmem [shape: f32[2,8,16], index: 0, kind: input, shape index: {}]   ;;  %s2945_s1 = inlined_call_operand.hbm [shape: f32[16,32], index: 1, kind: input, shape index: {}]   ;;  %s2946_s2 = inlined_call_operand.vmem [shape: f32[32,32], index: 2, kind: input, shape index: {}]   ;;  %s2947_s3 = inlined_call_operand.vmem [shape: f32[1,32], index: 3, kind: input, shape index: {}]   ;;  %s2948_s4 = inlined_call_operand.hbm [shape: f32[32,32], index: 4, kind: input, shape index: {}]   ;;  %s2949_s5 = inlined_call_operand.hbm [shape: f32[32,32], index: 5, kind: input, shape index: {}]   ;;  %s2950_s6 = inlined_call_operand.vmem [shape: f32[1,32], index: 6, kind: input, shape index: {}]   ;;  %s2951_s7 = inlined_call_operand.vmem [shape: f32[32,10], index: 7, kind: input, shape index: {}]   ;;  %s2952_s8 = inlined_call_operand.vmem [shape: f32[1,10], index: 8, kind: input, shape index: {}]   ;;  %s2953_s9 = inlined_call_operand.hbm [shape: f32[2,10], index: 9, kind: output, shape index: {}]  }
   0x1   :  { %15 = vsyncpa [#allocation8], 0 }
   0x2   :  { %16 = vsyncpa [#allocation6], 0  ;;  %s2541_s30 = smov [#allocation7]   ;;  %s2542_s11 = smov [#allocation4]  }
   0x3   :  { %s40_s10 = sshll.u32 %s2541_s30, 4  ;;  %s24_s12 = sshll.u32 %s2542_s11, 4  ;;  %s41_s10 = int_to_ptr.vmem [resolvable:$true] %s40_s10  ;;  %s25_s12 = int_to_ptr.vmem [resolvable:$true] %s24_s12 }
   0x4   :  { %s2463_s13 = scalar_lea.vmem %s41_s10, 512  ;;  %p2468_p1 = scmp.lt.s32.totalorder %s41_s10, %s41_s10 }
   0x5   :  { %p2464_p0 = scmp.ne.s32.totalorder %s41_s10, %s2463_s13  ;;  %p2469_p2 = scmp.lt.s32.totalorder %s2463_s13, %s2463_s13 }
   0x7   :  { %p2470_p3 = por %p2469_p2, %p2468_p1 }
   0x9   :  { %p2471_p4 = pnand %p2470_p3, %p2464_p0 }
   0xb   :  { %2474 = shalt.err (!%p2471_p4)
}
   0xc   :  { %s2543_s14 = smov 128   ;;  %s2544_s15 = smov 8  }
   0xd   :  { %46 = dma.hbm_to_vmem [thread:$0]  %s2948_s4, 512, %s41_s10, [#allocation8], %s2543_s14, %s2543_s14, %s2544_s15  }
   0xe   :  { %s2483_s18 = scalar_lea.vmem %s25_s12, 256  ;;  %p2488_p6 = scmp.lt.s32.totalorder %s25_s12, %s25_s12 }
   0xf   :  { %p2484_p5 = scmp.ne.s32.totalorder %s25_s12, %s2483_s18  ;;  %p2489_p7 = scmp.lt.s32.totalorder %s2483_s18, %s2483_s18 }
  0x11   :  { %p2490_p8 = por %p2489_p7, %p2488_p6 }
  0x13   :  { %p2491_p9 = pnand %p2490_p8, %p2484_p5 }
  0x15   :  { %2494 = shalt.err (!%p2491_p9)
}
  0x16   :  { %30 = dma.hbm_to_vmem [thread:$0]  %s2945_s1, 256, %s25_s12, [#allocation5], %s2543_s14, %s2543_s14, %s2544_s15  }
  0x17   :  { %s2545_s21 = smov [#allocation9]  }
  0x18   :  { %s52_s22 = sshll.u32 %s2545_s21, 4  ;;  %s53_s22 = int_to_ptr.vmem [resolvable:$true] %s52_s22 }
  0x19   :  { %s2503_s23 = scalar_lea.vmem %s53_s22, 512  ;;  %p2508_p11 = scmp.lt.s32.totalorder %s53_s22, %s53_s22 }
  0x1a   :  { %p2504_p10 = scmp.ne.s32.totalorder %s53_s22, %s2503_s23  ;;  %p2509_p12 = scmp.lt.s32.totalorder %s2503_s23, %s2503_s23 }
  0x1c   :  { %p2510_p13 = por %p2509_p12, %p2508_p11 }
  0x1e   :  { %p2511_p0 = pnand %p2510_p13, %p2504_p10 }
  0x20   :  { %2514 = shalt.err (!%p2511_p0)
}
  0x21   :  { %58 = dma.hbm_to_vmem [thread:$0]  %s2949_s5, 512, %s53_s22, [#allocation8], %s2543_s14, %s2543_s14, %s2544_s15  }
  0x22   :  { %2535 = dma.done.wait [#allocation5], 256  }
  0x23   :  { %2536 = vsyncadd [#allocation5], 4294967040 }
  0x24   :  { %2537 = dma.done.wait [#allocation8], 1024  }
  0x25   :  { %2538 = vsyncadd [#allocation8], 4294966272  ;;  %v2546_v0 = vmov 0.0   ;;  %vm2547_vm0 = vmmov 0   ;;  %v75_v1 = vld [vmem:[#allocation4 + $0x8] sm:$0xff]  ;;  %v74_v2 = vld [vmem:[#allocation4] sm:$0xff]  ;;  %v163_v11 = vlaneseq }
  0x26   :  { %2191 = vmatprep.subr.mxu1 %v2546_v0  ;;  %2195 = vmatprep.mubr.msk.f32.mxu1 %vm2547_vm0, %v2546_v0  ;;  %v77_v3 = vld [vmem:[%s2944_s0] sm:$0xff]  ;;  %vm84_vm1 = vcmask 130048   ;;  %v2621_v4 = vld [vmem:[%s2946_s2 + $0x18] sm:$0xff]  ;;  %v2629_v5 = vld [vmem:[%s2946_s2 + $0x10] sm:$0xff]  ;;  %v2548_v9 = vmov 1966171168  }
  0x27   :  { %2205 = vmatprep.subr.mxu0 %v2546_v0  ;;  %2213 = vmatprep.mubr.msk.f32.mxu0 %vm2547_vm0, %v2546_v0  ;;  %v2069_v6 = vld [vmem:[%s2944_s0 + $0x8] sm:$0xff]  ;;  %v2649_v8 = vld [vmem:[%s2946_s2] sm:$0xff]  ;;  %v161_v10 = vunpack.c.l.s4 %v2548_v9  ;;  %v164_v13 = vshrl.u32 %v163_v11, 7  ;;  %vm216_vm2 = vcmask 253952   ;;  %vm447_vm3 = vcmask 254976   ;;  %s2549_s4 = smov [#allocation10]  }
  0x28   :  { %2192 = vmatpush3.msra.mxu1 %v75_v1  ;;  %2206 = vmatpush3.msra.mxu0 %v2621_v4  ;;  %v2641_v7 = vld [vmem:[%s2946_s2 + $0x8] sm:$0xff]  ;;  %v2067_v14 = vld [vmem:[%s2947_s3] ss:$0 sm:$0xff]  ;;  %vm371_vm4 = vcmask 261120   ;;  %vm1030_vm5 = vcmask 1041409   ;;  %vm1033_vm6 = vcmask 1042434  }
  0x29   :  { %2193 = vmatprep.subr.mxu1 %v2546_v0  ;;  %2207 = vmatprep.subr.mxu0 %v2546_v0  ;;  %v162_v12 = vunpack.c.0.s8 %v161_v10  ;;  %vm1036_vm7 = vcmask 1043459   ;;  %vm1039_vm8 = vcmask 1044484   ;;  %vm1042_vm9 = vcmask 1045509   ;;  %s2057_s24 = sshll.u32 %s2549_s4, 4  ;;  %s2058_s24 = int_to_ptr.vmem [resolvable:$true] %s2057_s24 }
  0x2a   :  { %2194 = vmatpush3.msra.mxu1 %v74_v2  ;;  %2208 = vmatpush3.msra.mxu0 %v2629_v5  ;;  %vm1045_vm10 = vcmask 1046534   ;;  %vm1048_vm11 = vcmask 1047559   ;;  %vm2049_vm12 = vcmask 74752   ;;  %p2520_p2 = scmp.lt.s32.totalorder %s2058_s24, %s2058_s24 }
  0x2b   :  { %2196 = vmatmul.mubr.msk.f32.vlgmr.msra.gmra.mxu1 %vm84_vm1, %v77_v3  ;;  %2198 = vmatprep.subr.mxu1 %v2546_v0  ;;  %v2681_v15 = vsub.s32 %v162_v12, %v164_v13 }
  0x2c   :  { %2199 = vmatpush3.msra.mxu1 %v75_v1  ;;  %2202 = vmatprep.mubr.msk.f32.mxu1 %vm2547_vm0, %v2546_v0 }
  0x2d   :  { %2200 = vmatprep.subr.mxu1 %v2546_v0  ;;  %2209 = vmatprep.subr.mxu0 %v2546_v0 }
  0x2e   :  { %2201 = vmatpush3.msra.mxu1 %v74_v2  ;;  %2210 = vmatpush3.msra.mxu0 %v2641_v7 }
  0x2f   :  { %2203 = vmatmul.mubr.msk.f32.vlgmr.msra.gmra.mxu1 %vm84_vm1, %v2069_v6  ;;  %2211 = vmatprep.subr.mxu0 %v2546_v0 }
  0x30   :  { %2216 = vmatprep.subr.mxu1 %v2546_v0  ;;  %2212 = vmatpush3.msra.mxu0 %v2649_v8 }
  0x31   :  { %2217 = vmatpush3.msra.mxu1 %v2621_v4  ;;  %2214 = vmatmul.mubr.f32.vlgmr.msra.gmra.mxu0 %v2546_v0 }
  0x32   :  { %2218 = vmatprep.subr.mxu1 %v2546_v0  ;;  %2224 = vmatprep.mubr.msk.f32.mxu1 %vm2547_vm0, %v2546_v0 }
  0x33   :  { %2219 = vmatpush3.msra.mxu1 %v2629_v5  ;;  %2227 = vmatprep.subr.mxu0 %v2546_v0 }
  0x34   :  { %2220 = vmatprep.subr.mxu1 %v2546_v0  ;;  %2228 = vmatpush3.msra.mxu0 %v2621_v4 }
  0x35   :  { %2221 = vmatpush3.msra.mxu1 %v2641_v7  ;;  %2229 = vmatprep.subr.mxu0 %v2546_v0 }
  0x36   :  { %2222 = vmatprep.subr.mxu1 %v2546_v0  ;;  %2230 = vmatpush3.msra.mxu0 %v2629_v5 }
  0x37   :  { %2223 = vmatpush3.msra.mxu1 %v2649_v8  ;;  %2231 = vmatprep.subr.mxu0 %v2546_v0 }
  0x38   :  { %2235 = vmatprep.mubr.msk.f32.mxu0 %vm2547_vm0, %v2546_v0  ;;  %2232 = vmatpush3.msra.mxu0 %v2641_v7 }
  0x39   :  { %2238 = vmatprep.subr.mxu1 %v2546_v0  ;;  %2233 = vmatprep.subr.mxu0 %v2546_v0 }
  0x3a   :  { %2234 = vmatpush3.msra.mxu0 %v2649_v8 }
  0x3b   :  { %2249 = vmatprep.subr.mxu0 %v2546_v0 }
  0xeb   :  { %v154_v16 = vpop.f32.mrf.mxu1 }
  0xec   :  { %v155_v17 = vadd.f32 %v2067_v14, %v154_v16 }
  0xed   :  { %v2197_v18 = vpop.f32.mrf.mxu1 }
  0xee   :  { %v159_v19 = vcombine.high %v155_v17, %v155_v17  ;;  %v166_v20 = vrot.slane %v155_v17, %v2681_v15 }
  0xef   :  { %v296_v21 = vpop.f32.mrf.mxu1 }
  0xf0   :  { %v173_v22 = vrot.slane %v159_v19, %v2681_v15  ;;  %v174_v23 = vcombine.high %v166_v20, %v166_v20  ;;  %v182_v24 = vrot.slane %v166_v20, %v2681_v15  ;;  %v297_v25 = vadd.f32 %v2067_v14, %v296_v21  ;;  %v1005_v21 = vld [vmem:[#allocation7 + $0x18] sm:$0xff] }
  0xf1   :  { %v2204_v26 = vpop.f32.mrf.mxu1  ;;  %v441_v31 = vpop.f32.mrf.mxu0 }
  0xf2   :  { %v175_v27 = vcombine.high %v173_v22, %v173_v22  ;;  %v189_v28 = vrot.slane %v173_v22, %v2681_v15  ;;  %v196_v29 = vrot.slane %v174_v23, %v2681_v15  ;;  %v204_v30 = vcombine.high %v182_v24, %v182_v24  ;;  %217 = vst.msk [vmem:[#allocation2] sm:$0x1] %vm216_vm2, %v182_v24  ;;  %v1004_v22 = vld [vmem:[#allocation7 + $0x10] sm:$0xff]  ;;  %v1003_v23 = vld [vmem:[#allocation7 + $0x8] sm:$0xff]  ;;  %v1002_v24 = vld [vmem:[#allocation7] sm:$0xff] }
  0xf3   :  { %v301_v32 = vcombine.high %v297_v25, %v297_v25  ;;  %v308_v33 = vrot.slane %v297_v25, %v2681_v15  ;;  %v2215_v37 = vpop.f32.mrf.mxu0 }
  0xf4   :  { %v203_v34 = vrot.slane %v175_v27, %v2681_v15  ;;  %v205_v35 = vcombine.high %v189_v28, %v189_v28  ;;  %v206_v36 = vcombine.high %v196_v29, %v196_v29  ;;  %218 = vst.msk [vmem:[#allocation2 + $0x2] sm:$0x1] %vm216_vm2, %v196_v29  ;;  %219 = vst.msk [vmem:[#allocation2 + $0x4] sm:$0x1] %vm216_vm2, %v204_v30 }
  0xf5   :  { %221 = vst.msk [vmem:[#allocation2 + $0x8] sm:$0x1] %vm216_vm2, %v189_v28  ;;  %v315_v38 = vrot.slane %v301_v32, %v2681_v15  ;;  %v316_v39 = vcombine.high %v308_v33, %v308_v33  ;;  %v324_v40 = vrot.slane %v308_v33, %v2681_v15 }
  0xf6   :  { %v207_v41 = vcombine.high %v203_v34, %v203_v34  ;;  %220 = vst.msk [vmem:[#allocation2 + $0x6] sm:$0x1] %vm216_vm2, %v206_v36  ;;  %222 = vst.msk [vmem:[#allocation2 + $0xa] sm:$0x1] %vm216_vm2, %v203_v34 }
  0xf7   :  { %223 = vst.msk [vmem:[#allocation2 + $0xc] sm:$0x1] %vm216_vm2, %v205_v35  ;;  %v317_v42 = vcombine.high %v315_v38, %v315_v38  ;;  %v331_v43 = vrot.slane %v315_v38, %v2681_v15  ;;  %v338_v44 = vrot.slane %v316_v39, %v2681_v15  ;;  %v346_v45 = vcombine.high %v324_v40, %v324_v40 }
  0xf8   :  { %358 = vst.msk [vmem:[#allocation2 + $0x1] sm:$0x1] %vm216_vm2, %v324_v40  ;;  %224 = vst.msk [vmem:[#allocation2 + $0xe] sm:$0x1] %vm216_vm2, %v207_v41 }
  0xf9   :  { %v345_v46 = vrot.slane %v317_v42, %v2681_v15  ;;  %v347_v47 = vcombine.high %v331_v43, %v331_v43  ;;  %v348_v48 = vcombine.high %v338_v44, %v338_v44  ;;  %359 = vst.msk [vmem:[#allocation2 + $0x3] sm:$0x1] %vm216_vm2, %v338_v44  ;;  %360 = vst.msk [vmem:[#allocation2 + $0x5] sm:$0x1] %vm216_vm2, %v346_v45 }
  0xfa   :  { %362 = vst.msk [vmem:[#allocation2 + $0x9] sm:$0x1] %vm216_vm2, %v331_v43 }
  0xfb   :  { %v349_v49 = vcombine.high %v345_v46, %v345_v46  ;;  %361 = vst.msk [vmem:[#allocation2 + $0x7] sm:$0x1] %vm216_vm2, %v348_v48  ;;  %363 = vst.msk [vmem:[#allocation2 + $0xb] sm:$0x1] %vm216_vm2, %v345_v46 }
  0xfc   :  { %364 = vst.msk [vmem:[#allocation2 + $0xd] sm:$0x1] %vm216_vm2, %v347_v47 }
  0xfd   :  { %365 = vst.msk [vmem:[#allocation2 + $0xf] sm:$0x1] %vm216_vm2, %v349_v49 }
  0xff   :  { %v370_v50 = vld [vmem:[#allocation2] sm:$0x3] }
 0x100   :  { %v445_v51 = vadd.f32 %v441_v31, %v370_v50  ;;  %v450_v53 = vld [vmem:[#allocation2 + $0x2] sm:$0x3]  ;;  %v529_v58 = vld [vmem:[#allocation2 + $0x4] sm:$0x3] }
 0x101   :  { %v687_v9 = vld [vmem:[#allocation2 + $0x8] sm:$0x3] }
 0x102   :  { %2423 = vtanh.f32 %v445_v51  ;;  %v608_v63 = vld [vmem:[#allocation2 + $0x6] sm:$0x3]  ;;  %v766_v14 = vld [vmem:[#allocation2 + $0xa] sm:$0x3] }
 0x104   :  { %v924_v25 = vld [vmem:[#allocation2 + $0xe] sm:$0x3] }
 0x10f   :  { %v2424_v52 = vpop.eup %2423 }
 0x110   :  { %448 = vst.msk [vmem:[#allocation3] sm:$0x3] %vm447_vm3, %v2424_v52  ;;  %2225 = vmatmul.mubr.msk.f32.vlgmr.msra.gmra.mxu1 %vm371_vm4, %v2424_v52 }
 0x111   :  { %2239 = vmatpush3.msra.mxu1 %v2621_v4  ;;  %2246 = vmatprep.mubr.msk.f32.mxu1 %vm2547_vm0, %v2546_v0 }
 0x112   :  { %2240 = vmatprep.subr.mxu1 %v2546_v0 }
 0x113   :  { %2241 = vmatpush3.msra.mxu1 %v2629_v5 }
 0x114   :  { %2242 = vmatprep.subr.mxu1 %v2546_v0 }
 0x115   :  { %2243 = vmatpush3.msra.mxu1 %v2641_v7 }
 0x116   :  { %2244 = vmatprep.subr.mxu1 %v2546_v0 }
 0x117   :  { %2245 = vmatpush3.msra.mxu1 %v2649_v8  ;;  %v1007_v35 = vld [vmem:[#allocation3] sm:$0x1]  ;;  %v1188_v41 = vld [vmem:[#allocation3 + $0x1] sm:$0x1] }
 0x118   :  { %2260 = vmatprep.subr.mxu1 %v2546_v0 }
 0x1d0   :  { %v520_v54 = vpop.f32.mrf.mxu1 }
 0x1d1   :  { %v524_v55 = vadd.f32 %v520_v54, %v450_v53 }
 0x1d2   :  { %v2226_v56 = vpop.f32.mrf.mxu1 }
 0x1d3   :  { %2425 = vtanh.f32 %v524_v55 }
 0x1e0   :  { %v2426_v57 = vpop.eup %2425 }
 0x1e1   :  { %527 = vst.msk [vmem:[#allocation3 + $0x2] sm:$0x3] %vm447_vm3, %v2426_v57  ;;  %2236 = vmatmul.mubr.msk.f32.vlgmr.msra.gmra.mxu0 %vm371_vm4, %v2426_v57 }
 0x1e2   :  { %2250 = vmatpush3.msra.mxu0 %v2621_v4  ;;  %2257 = vmatprep.mubr.msk.f32.mxu0 %vm2547_vm0, %v2546_v0 }
 0x1e3   :  { %2251 = vmatprep.subr.mxu0 %v2546_v0 }
 0x1e4   :  { %2252 = vmatpush3.msra.mxu0 %v2629_v5 }
 0x1e5   :  { %2253 = vmatprep.subr.mxu0 %v2546_v0 }
 0x1e6   :  { %2254 = vmatpush3.msra.mxu0 %v2641_v7 }
 0x1e7   :  { %2255 = vmatprep.subr.mxu0 %v2546_v0 }
 0x1e8   :  { %2256 = vmatpush3.msra.mxu0 %v2649_v8  ;;  %v1008_v29 = vld [vmem:[#allocation3 + $0x2] sm:$0x1]  ;;  %v1189_v30 = vld [vmem:[#allocation3 + $0x3] sm:$0x1] }
 0x1e9   :  { %2271 = vmatprep.subr.mxu0 %v2546_v0  ;;  %v1029_v32 = vrot.slane %v1008_v29, 7  ;;  %v1204_v38 = vrot.slane %v1189_v30, 7 }
 0x1eb   :  { %v1031_v47 = vsel %vm1030_vm5, %v1029_v32, %v1007_v35  ;;  %v1205_v52 = vsel %vm1030_vm5, %v1204_v38, %v1188_v41 }
 0x2a1   :  { %v599_v59 = vpop.f32.mrf.mxu0 }
 0x2a2   :  { %v603_v60 = vadd.f32 %v599_v59, %v529_v58 }
 0x2a3   :  { %v2237_v61 = vpop.f32.mrf.mxu0 }
 0x2a4   :  { %2427 = vtanh.f32 %v603_v60 }
 0x2b1   :  { %v2428_v62 = vpop.eup %2427 }
 0x2b2   :  { %606 = vst.msk [vmem:[#allocation3 + $0x4] sm:$0x3] %vm447_vm3, %v2428_v62  ;;  %2247 = vmatmul.mubr.msk.f32.vlgmr.msra.gmra.mxu1 %vm371_vm4, %v2428_v62 }
 0x2b3   :  { %2261 = vmatpush3.msra.mxu1 %v2621_v4  ;;  %2268 = vmatprep.mubr.msk.f32.mxu1 %vm2547_vm0, %v2546_v0 }
 0x2b4   :  { %2262 = vmatprep.subr.mxu1 %v2546_v0 }
 0x2b5   :  { %2263 = vmatpush3.msra.mxu1 %v2629_v5 }
 0x2b6   :  { %2264 = vmatprep.subr.mxu1 %v2546_v0 }
 0x2b7   :  { %2265 = vmatpush3.msra.mxu1 %v2641_v7 }
 0x2b8   :  { %2266 = vmatprep.subr.mxu1 %v2546_v0 }
 0x2b9   :  { %2267 = vmatpush3.msra.mxu1 %v2649_v8  ;;  %v1009_v31 = vld [vmem:[#allocation3 + $0x4] sm:$0x1]  ;;  %v1190_v33 = vld [vmem:[#allocation3 + $0x5] sm:$0x1] }
 0x2ba   :  { %2282 = vmatprep.subr.mxu1 %v2546_v0  ;;  %v1032_v40 = vrot.slane %v1009_v31, 6  ;;  %v1206_v45 = vrot.slane %v1190_v33, 6 }
 0x2bc   :  { %v1034_v54 = vsel %vm1033_vm6, %v1032_v40, %v1031_v47  ;;  %v1207_v58 = vsel %vm1033_vm6, %v1206_v45, %v1205_v52 }
 0x372   :  { %v678_v1 = vpop.f32.mrf.mxu1 }
 0x373   :  { %v682_v2 = vadd.f32 %v678_v1, %v608_v63 }
 0x374   :  { %v2248_v3 = vpop.f32.mrf.mxu1 }
 0x375   :  { %2429 = vtanh.f32 %v682_v2 }
 0x382   :  { %v2430_v6 = vpop.eup %2429 }
 0x383   :  { %685 = vst.msk [vmem:[#allocation3 + $0x6] sm:$0x3] %vm447_vm3, %v2430_v6  ;;  %2258 = vmatmul.mubr.msk.f32.vlgmr.msra.gmra.mxu0 %vm371_vm4, %v2430_v6 }
 0x384   :  { %2272 = vmatpush3.msra.mxu0 %v2621_v4  ;;  %2279 = vmatprep.mubr.msk.f32.mxu0 %vm2547_vm0, %v2546_v0 }
 0x385   :  { %2273 = vmatprep.subr.mxu0 %v2546_v0 }
 0x386   :  { %2274 = vmatpush3.msra.mxu0 %v2629_v5 }
 0x387   :  { %2275 = vmatprep.subr.mxu0 %v2546_v0 }
 0x388   :  { %2276 = vmatpush3.msra.mxu0 %v2641_v7 }
 0x389   :  { %2277 = vmatprep.subr.mxu0 %v2546_v0 }
 0x38a   :  { %2278 = vmatpush3.msra.mxu0 %v2649_v8  ;;  %v1010_v36 = vld [vmem:[#allocation3 + $0x6] sm:$0x1]  ;;  %v1191_v37 = vld [vmem:[#allocation3 + $0x7] sm:$0x1] }
 0x38b   :  { %2293 = vmatprep.subr.mxu0 %v2546_v0  ;;  %v1035_v48 = vrot.slane %v1010_v36, 5  ;;  %v1208_v50 = vrot.slane %v1191_v37, 5 }
 0x38d   :  { %v1037_v60 = vsel %vm1036_vm7, %v1035_v48, %v1034_v54  ;;  %v1209_v61 = vsel %vm1036_vm7, %v1208_v50, %v1207_v58 }
 0x443   :  { %v757_v10 = vpop.f32.mrf.mxu0 }
 0x444   :  { %v761_v11 = vadd.f32 %v757_v10, %v687_v9 }
 0x445   :  { %v2259_v12 = vpop.f32.mrf.mxu0 }
 0x446   :  { %2431 = vtanh.f32 %v761_v11 }
 0x453   :  { %v2432_v13 = vpop.eup %2431 }
 0x454   :  { %764 = vst.msk [vmem:[#allocation3 + $0x8] sm:$0x3] %vm447_vm3, %v2432_v13  ;;  %2269 = vmatmul.mubr.msk.f32.vlgmr.msra.gmra.mxu1 %vm371_vm4, %v2432_v13  ;;  %v2792_v13 = vld [vmem:[#allocation9 + $0x18] sm:$0xff] }
 0x455   :  { %2283 = vmatpush3.msra.mxu1 %v2621_v4  ;;  %2290 = vmatprep.mubr.msk.f32.mxu1 %vm2547_vm0, %v2546_v0 }
 0x456   :  { %2284 = vmatprep.subr.mxu1 %v2546_v0 }
 0x457   :  { %2285 = vmatpush3.msra.mxu1 %v2629_v5  ;;  %v845_v5 = vld [vmem:[#allocation2 + $0xc] sm:$0x3] }
 0x458   :  { %2286 = vmatprep.subr.mxu1 %v2546_v0 }
 0x459   :  { %2287 = vmatpush3.msra.mxu1 %v2641_v7 }
 0x45a   :  { %2288 = vmatprep.subr.mxu1 %v2546_v0 }
 0x45b   :  { %2289 = vmatpush3.msra.mxu1 %v2649_v8  ;;  %v1011_v39 = vld [vmem:[#allocation3 + $0x8] sm:$0x1]  ;;  %v1192_v42 = vld [vmem:[#allocation3 + $0x9] sm:$0x1] }
 0x45c   :  { %2304 = vmatprep.subr.mxu1 %v2546_v0  ;;  %v1038_v51 = vrot.slane %v1011_v39, 4  ;;  %v1210_v53 = vrot.slane %v1192_v42, 4 }
 0x45e   :  { %v1040_v63 = vsel %vm1039_vm8, %v1038_v51, %v1037_v60  ;;  %v1211_v2 = vsel %vm1039_vm8, %v1210_v53, %v1209_v61 }
 0x514   :  { %v836_v16 = vpop.f32.mrf.mxu1 }
 0x515   :  { %v840_v4 = vadd.f32 %v836_v16, %v766_v14 }
 0x516   :  { %v2270_v17 = vpop.f32.mrf.mxu1 }
 0x517   :  { %2433 = vtanh.f32 %v840_v4  ;;  %v2796_v4 = vld [vmem:[#allocation9 + $0x10] sm:$0xff]  ;;  %v2802_v17 = vld [vmem:[#allocation9 + $0x8] sm:$0xff] }
 0x524   :  { %v2434_v18 = vpop.eup %2433 }
 0x525   :  { %843 = vst.msk [vmem:[#allocation3 + $0xa] sm:$0x3] %vm447_vm3, %v2434_v18  ;;  %2280 = vmatmul.mubr.msk.f32.vlgmr.msra.gmra.mxu0 %vm371_vm4, %v2434_v18  ;;  %v2808_v18 = vld [vmem:[#allocation9] sm:$0xff] }
 0x526   :  { %2301 = vmatprep.mubr.msk.f32.mxu0 %vm2547_vm0, %v2546_v0  ;;  %2294 = vmatpush3.msra.mxu0 %v1005_v21 }
 0x527   :  { %2295 = vmatprep.subr.mxu0 %v2546_v0 }
 0x528   :  { %2296 = vmatpush3.msra.mxu0 %v1004_v22 }
 0x529   :  { %2297 = vmatprep.subr.mxu0 %v2546_v0 }
 0x52a   :  { %2298 = vmatpush3.msra.mxu0 %v1003_v23 }
 0x52b   :  { %2299 = vmatprep.subr.mxu0 %v2546_v0 }
 0x52c   :  { %2300 = vmatpush3.msra.mxu0 %v1002_v24  ;;  %v1012_v43 = vld [vmem:[#allocation3 + $0xa] sm:$0x1]  ;;  %v1193_v44 = vld [vmem:[#allocation3 + $0xb] sm:$0x1] }
 0x52d   :  { %2315 = vmatprep.subr.mxu0 %v2546_v0  ;;  %v1041_v55 = vrot.slane %v1012_v43, 3  ;;  %v1212_v56 = vrot.slane %v1193_v44, 3 }
 0x52f   :  { %v1043_v3 = vsel %vm1042_vm9, %v1041_v55, %v1040_v63  ;;  %v1213_v9 = vsel %vm1042_vm9, %v1212_v56, %v1211_v2 }
 0x5e5   :  { %v915_v7 = vpop.f32.mrf.mxu0 }
 0x5e6   :  { %v919_v19 = vadd.f32 %v915_v7, %v845_v5  ;;  %v2078_v5 = vld [vmem:[%s2950_s6] ss:$0 sm:$0xff] }
 0x5e7   :  { %v2281_v20 = vpop.f32.mrf.mxu0 }
 0x5e8   :  { %2435 = vtanh.f32 %v919_v19 }
 0x5f5   :  { %v2436_v8 = vpop.eup %2435 }
 0x5f6   :  { %922 = vst.msk [vmem:[#allocation3 + $0xc] sm:$0x3] %vm447_vm3, %v2436_v8  ;;  %2291 = vmatmul.mubr.msk.f32.vlgmr.msra.gmra.mxu1 %vm371_vm4, %v2436_v8 }
 0x5f7   :  { %2312 = vmatprep.mubr.msk.f32.mxu1 %vm2547_vm0, %v2546_v0  ;;  %2305 = vmatpush3.msra.mxu1 %v1005_v21 }
 0x5f8   :  { %2306 = vmatprep.subr.mxu1 %v2546_v0 }
 0x5f9   :  { %2307 = vmatpush3.msra.mxu1 %v1004_v22 }
 0x5fa   :  { %2308 = vmatprep.subr.mxu1 %v2546_v0 }
 0x5fb   :  { %2309 = vmatpush3.msra.mxu1 %v1003_v23 }
 0x5fc   :  { %2310 = vmatprep.subr.mxu1 %v2546_v0 }
 0x5fd   :  { %2311 = vmatpush3.msra.mxu1 %v1002_v24  ;;  %v1013_v46 = vld [vmem:[#allocation3 + $0xc] sm:$0x1]  ;;  %v1194_v49 = vld [vmem:[#allocation3 + $0xd] sm:$0x1] }
 0x5fe   :  { %2326 = vmatprep.subr.mxu1 %v2546_v0  ;;  %v1044_v57 = vrot.slane %v1013_v46, 2  ;;  %v1214_v59 = vrot.slane %v1194_v49, 2 }
 0x600   :  { %v1046_v11 = vsel %vm1045_vm10, %v1044_v57, %v1043_v3  ;;  %v1215_v12 = vsel %vm1045_vm10, %v1214_v59, %v1213_v9 }
 0x6b6   :  { %v994_v26 = vpop.f32.mrf.mxu1 }
 0x6b7   :  { %v998_v27 = vadd.f32 %v994_v26, %v924_v25 }
 0x6b8   :  { %v2292_v28 = vpop.f32.mrf.mxu1 }
 0x6b9   :  { %2437 = vtanh.f32 %v998_v27 }
 0x6c6   :  { %v2438_v34 = vpop.eup %2437 }
 0x6c7   :  { %1001 = vst.msk [vmem:[#allocation3 + $0xe] sm:$0x3] %vm447_vm3, %v2438_v34 }
 0x6ce   :  { %v1014_v62 = vld [vmem:[#allocation3 + $0xe] sm:$0x1]  ;;  %v1195_v1 = vld [vmem:[#allocation3 + $0xf] sm:$0x1] }
 0x6cf   :  { %v1047_v6 = vrot.slane %v1014_v62, 1  ;;  %v1216_v10 = vrot.slane %v1195_v1, 1 }
 0x6d1   :  { %v1049_v14 = vsel %vm1048_vm11, %v1047_v6, %v1046_v11  ;;  %v1217_v16 = vsel %vm1048_vm11, %v1216_v10, %v1215_v12 }
 0x6d2   :  { %2302 = vmatmul.mubr.msk.f32.vlgmr.msra.gmra.mxu0 %vm371_vm4, %v1049_v14  ;;  %2313 = vmatmul.mubr.msk.f32.vlgmr.msra.gmra.mxu1 %vm371_vm4, %v1217_v16 }
 0x6d3   :  { %2316 = vmatpush3.msra.mxu0 %v2792_v13  ;;  %2323 = vmatprep.mubr.msk.f32.mxu0 %vm2547_vm0, %v2546_v0 }
 0x6d4   :  { %2317 = vmatprep.subr.mxu0 %v2546_v0  ;;  %2327 = vmatpush3.msra.mxu1 %v2792_v13 }
 0x6d5   :  { %2318 = vmatpush3.msra.mxu0 %v2796_v4  ;;  %2328 = vmatprep.subr.mxu1 %v2546_v0 }
 0x6d6   :  { %2319 = vmatprep.subr.mxu0 %v2546_v0  ;;  %2329 = vmatpush3.msra.mxu1 %v2796_v4 }
 0x6d7   :  { %2320 = vmatpush3.msra.mxu0 %v2802_v17  ;;  %2330 = vmatprep.subr.mxu1 %v2546_v0 }
 0x6d8   :  { %2321 = vmatprep.subr.mxu0 %v2546_v0  ;;  %2331 = vmatpush3.msra.mxu1 %v2802_v17 }
 0x6d9   :  { %2322 = vmatpush3.msra.mxu0 %v2808_v18  ;;  %2332 = vmatprep.subr.mxu1 %v2546_v0 }
 0x6da   :  { %2324 = vmatmul.mubr.f32.vlgmr.msra.gmra.mxu0 %v2546_v0  ;;  %2333 = vmatpush3.msra.mxu1 %v2808_v18 }
 0x6db   :  { %2334 = vmatprep.mubr.msk.f32.mxu1 %vm2547_vm0, %v2546_v0  ;;  %2337 = vmatprep.subr.mxu0 %v2546_v0 }
 0x6dc   :  { %2338 = vmatpush3.msra.mxu0 %v2792_v13  ;;  %2345 = vmatprep.mubr.msk.f32.mxu0 %vm2547_vm0, %v2546_v0 }
 0x6dd   :  { %2339 = vmatprep.subr.mxu0 %v2546_v0  ;;  %2348 = vmatprep.subr.mxu1 %v2546_v0 }
 0x6de   :  { %2340 = vmatpush3.msra.mxu0 %v2796_v4 }
 0x6df   :  { %2341 = vmatprep.subr.mxu0 %v2546_v0 }
 0x6e0   :  { %2342 = vmatpush3.msra.mxu0 %v2802_v17 }
 0x6e1   :  { %2343 = vmatprep.subr.mxu0 %v2546_v0 }
 0x6e2   :  { %2344 = vmatpush3.msra.mxu0 %v2808_v18 }
 0x6e3   :  { %2359 = vmatprep.subr.mxu0 %v2546_v0 }
 0x792   :  { %v1118_v7 = vpop.f32.mrf.mxu0  ;;  %v1286_v19 = vpop.f32.mrf.mxu1 }
 0x793   :  { %v1119_v20 = vadd.f32 %v2078_v5, %v1118_v7  ;;  %v1287_v8 = vadd.f32 %v2078_v5, %v1286_v19 }
 0x794   :  { %v2303_v21 = vpop.f32.mrf.mxu0  ;;  %v2314_v22 = vpop.f32.mrf.mxu1 }
 0x795   :  { %v1123_v23 = vcombine.high %v1119_v20, %v1119_v20  ;;  %v1130_v24 = vrot.slane %v1119_v20, %v2681_v15  ;;  %v1291_v25 = vcombine.high %v1287_v8, %v1287_v8  ;;  %v1298_v26 = vrot.slane %v1287_v8, %v2681_v15  ;;  %v1967_v22 = vld [vmem:[%s2951_s7 + $0x10] sm:$0xff] }
 0x797   :  { %v1137_v27 = vrot.slane %v1123_v23, %v2681_v15  ;;  %v1138_v28 = vcombine.high %v1130_v24, %v1130_v24  ;;  %v1146_v29 = vrot.slane %v1130_v24, %v2681_v15  ;;  %v1305_v30 = vrot.slane %v1291_v25, %v2681_v15  ;;  %v1966_v23 = vld [vmem:[%s2951_s7 + $0x8] sm:$0xff]  ;;  %v1965_v24 = vld [vmem:[%s2951_s7] sm:$0xff] }
 0x798   :  { %v1306_v31 = vcombine.high %v1298_v26, %v1298_v26  ;;  %v1314_v32 = vrot.slane %v1298_v26, %v2681_v15 }
 0x799   :  { %v1139_v33 = vcombine.high %v1137_v27, %v1137_v27  ;;  %v1153_v34 = vrot.slane %v1137_v27, %v2681_v15  ;;  %v1160_v35 = vrot.slane %v1138_v28, %v2681_v15  ;;  %v1168_v36 = vcombine.high %v1146_v29, %v1146_v29  ;;  %1180 = vst.msk [vmem:[#allocation2] sm:$0x1] %vm216_vm2, %v1146_v29 }
 0x79a   :  { %v1307_v37 = vcombine.high %v1305_v30, %v1305_v30  ;;  %v1321_v38 = vrot.slane %v1305_v30, %v2681_v15  ;;  %v1328_v39 = vrot.slane %v1306_v31, %v2681_v15  ;;  %v1336_v40 = vcombine.high %v1314_v32, %v1314_v32  ;;  %1348 = vst.msk [vmem:[#allocation2 + $0x1] sm:$0x1] %vm216_vm2, %v1314_v32  ;;  %v1427_v41 = vpop.f32.mrf.mxu0  ;;  %v2088_v30 = vld [vmem:[%s2952_s8] ss:$0 sm:$0xff] }
 0x79b   :  { %v1167_v42 = vrot.slane %v1139_v33, %v2681_v15  ;;  %v1169_v43 = vcombine.high %v1153_v34, %v1153_v34  ;;  %v1170_v44 = vcombine.high %v1160_v35, %v1160_v35  ;;  %1181 = vst.msk [vmem:[#allocation2 + $0x2] sm:$0x1] %vm216_vm2, %v1160_v35  ;;  %1182 = vst.msk [vmem:[#allocation2 + $0x4] sm:$0x1] %vm216_vm2, %v1168_v36 }
 0x79c   :  { %1184 = vst.msk [vmem:[#allocation2 + $0x8] sm:$0x1] %vm216_vm2, %v1153_v34  ;;  %v1335_v45 = vrot.slane %v1307_v37, %v2681_v15  ;;  %v1337_v46 = vcombine.high %v1321_v38, %v1321_v38  ;;  %v1338_v47 = vcombine.high %v1328_v39, %v1328_v39  ;;  %1349 = vst.msk [vmem:[#allocation2 + $0x3] sm:$0x1] %vm216_vm2, %v1328_v39  ;;  %v2325_v48 = vpop.f32.mrf.mxu0 }
 0x79d   :  { %1350 = vst.msk [vmem:[#allocation2 + $0x5] sm:$0x1] %vm216_vm2, %v1336_v40  ;;  %1352 = vst.msk [vmem:[#allocation2 + $0x9] sm:$0x1] %vm216_vm2, %v1321_v38  ;;  %v1171_v49 = vcombine.high %v1167_v42, %v1167_v42 }
 0x79e   :  { %1183 = vst.msk [vmem:[#allocation2 + $0x6] sm:$0x1] %vm216_vm2, %v1170_v44  ;;  %1185 = vst.msk [vmem:[#allocation2 + $0xa] sm:$0x1] %vm216_vm2, %v1167_v42  ;;  %v1339_v50 = vcombine.high %v1335_v45, %v1335_v45 }
 0x79f   :  { %1186 = vst.msk [vmem:[#allocation2 + $0xc] sm:$0x1] %vm216_vm2, %v1169_v43  ;;  %1351 = vst.msk [vmem:[#allocation2 + $0x7] sm:$0x1] %vm216_vm2, %v1338_v47 }
 0x7a0   :  { %1353 = vst.msk [vmem:[#allocation2 + $0xb] sm:$0x1] %vm216_vm2, %v1335_v45  ;;  %1354 = vst.msk [vmem:[#allocation2 + $0xd] sm:$0x1] %vm216_vm2, %v1337_v46 }
 0x7a1   :  { %1187 = vst.msk [vmem:[#allocation2 + $0xe] sm:$0x1] %vm216_vm2, %v1171_v49  ;;  %1355 = vst.msk [vmem:[#allocation2 + $0xf] sm:$0x1] %vm216_vm2, %v1339_v50  ;;  %v1360_v15 = vld [vmem:[#allocation2] sm:$0x3] }
 0x7a2   :  { %v1431_v51 = vadd.f32 %v1427_v41, %v1360_v15 }
 0x7a3   :  { %v1433_v53 = vld [vmem:[#allocation2 + $0x2] sm:$0x3] }
 0x7a4   :  { %2439 = vtanh.f32 %v1431_v51  ;;  %v1509_v58 = vld [vmem:[#allocation2 + $0x4] sm:$0x3]  ;;  %v1661_v9 = vld [vmem:[#allocation2 + $0x8] sm:$0x3] }
 0x7a6   :  { %v1585_v63 = vld [vmem:[#allocation2 + $0x6] sm:$0x3] }
 0x7a7   :  { %v1737_v16 = vld [vmem:[#allocation2 + $0xa] sm:$0x3] }
 0x7a8   :  { %v1889_v25 = vld [vmem:[#allocation2 + $0xe] sm:$0x3] }
 0x7b1   :  { %v2440_v52 = vpop.eup %2439 }
 0x7b2   :  { %2335 = vmatmul.mubr.msk.f32.vlgmr.msra.gmra.mxu1 %vm371_vm4, %v2440_v52 }
 0x7b3   :  { %2349 = vmatpush3.msra.mxu1 %v2792_v13  ;;  %2356 = vmatprep.mubr.msk.f32.mxu1 %vm2547_vm0, %v2546_v0 }
 0x7b4   :  { %2350 = vmatprep.subr.mxu1 %v2546_v0 }
 0x7b5   :  { %2351 = vmatpush3.msra.mxu1 %v2796_v4 }
 0x7b6   :  { %2352 = vmatprep.subr.mxu1 %v2546_v0 }
 0x7b7   :  { %2353 = vmatpush3.msra.mxu1 %v2802_v17 }
 0x7b8   :  { %2354 = vmatprep.subr.mxu1 %v2546_v0 }
 0x7b9   :  { %2355 = vmatpush3.msra.mxu1 %v2808_v18 }
 0x7ba   :  { %2370 = vmatprep.subr.mxu1 %v2546_v0 }
 0x872   :  { %v1503_v54 = vpop.f32.mrf.mxu1 }
 0x873   :  { %v1507_v55 = vadd.f32 %v1503_v54, %v1433_v53 }
 0x874   :  { %v2336_v56 = vpop.f32.mrf.mxu1 }
 0x875   :  { %2441 = vtanh.f32 %v1507_v55 }
 0x882   :  { %v2442_v57 = vpop.eup %2441 }
 0x883   :  { %2346 = vmatmul.mubr.msk.f32.vlgmr.msra.gmra.mxu0 %vm371_vm4, %v2442_v57 }
 0x884   :  { %2360 = vmatpush3.msra.mxu0 %v2792_v13  ;;  %2367 = vmatprep.mubr.msk.f32.mxu0 %vm2547_vm0, %v2546_v0 }
 0x885   :  { %2361 = vmatprep.subr.mxu0 %v2546_v0 }
 0x886   :  { %2362 = vmatpush3.msra.mxu0 %v2796_v4 }
 0x887   :  { %2363 = vmatprep.subr.mxu0 %v2546_v0 }
 0x888   :  { %2364 = vmatpush3.msra.mxu0 %v2802_v17 }
 0x889   :  { %2365 = vmatprep.subr.mxu0 %v2546_v0 }
 0x88a   :  { %2366 = vmatpush3.msra.mxu0 %v2808_v18 }
 0x88b   :  { %2381 = vmatprep.subr.mxu0 %v2546_v0 }
 0x943   :  { %v1579_v59 = vpop.f32.mrf.mxu0 }
 0x944   :  { %v1583_v60 = vadd.f32 %v1579_v59, %v1509_v58 }
 0x945   :  { %v2347_v61 = vpop.f32.mrf.mxu0 }
 0x946   :  { %2443 = vtanh.f32 %v1583_v60 }
 0x953   :  { %v2444_v62 = vpop.eup %2443 }
 0x954   :  { %2357 = vmatmul.mubr.msk.f32.vlgmr.msra.gmra.mxu1 %vm371_vm4, %v2444_v62 }
 0x955   :  { %2371 = vmatpush3.msra.mxu1 %v2792_v13  ;;  %2378 = vmatprep.mubr.msk.f32.mxu1 %vm2547_vm0, %v2546_v0 }
 0x956   :  { %2372 = vmatprep.subr.mxu1 %v2546_v0 }
 0x957   :  { %2373 = vmatpush3.msra.mxu1 %v2796_v4 }
 0x958   :  { %2374 = vmatprep.subr.mxu1 %v2546_v0 }
 0x959   :  { %2375 = vmatpush3.msra.mxu1 %v2802_v17 }
 0x95a   :  { %2376 = vmatprep.subr.mxu1 %v2546_v0 }
 0x95b   :  { %2377 = vmatpush3.msra.mxu1 %v2808_v18 }
 0x95c   :  { %2392 = vmatprep.subr.mxu1 %v2546_v0 }
 0xa14   :  { %v1655_v1 = vpop.f32.mrf.mxu1 }
 0xa15   :  { %v1659_v2 = vadd.f32 %v1655_v1, %v1585_v63 }
 0xa16   :  { %v2358_v3 = vpop.f32.mrf.mxu1 }
 0xa17   :  { %2445 = vtanh.f32 %v1659_v2 }
 0xa24   :  { %v2446_v6 = vpop.eup %2445 }
 0xa25   :  { %2368 = vmatmul.mubr.msk.f32.vlgmr.msra.gmra.mxu0 %vm371_vm4, %v2446_v6 }
 0xa26   :  { %2382 = vmatpush3.msra.mxu0 %v2792_v13  ;;  %2389 = vmatprep.mubr.msk.f32.mxu0 %vm2547_vm0, %v2546_v0 }
 0xa27   :  { %2383 = vmatprep.subr.mxu0 %v2546_v0 }
 0xa28   :  { %2384 = vmatpush3.msra.mxu0 %v2796_v4 }
 0xa29   :  { %2385 = vmatprep.subr.mxu0 %v2546_v0 }
 0xa2a   :  { %2386 = vmatpush3.msra.mxu0 %v2802_v17 }
 0xa2b   :  { %2387 = vmatprep.subr.mxu0 %v2546_v0 }
 0xa2c   :  { %2388 = vmatpush3.msra.mxu0 %v2808_v18 }
 0xa2d   :  { %2403 = vmatprep.subr.mxu0 %v2546_v0 }
 0xae5   :  { %v1731_v10 = vpop.f32.mrf.mxu0 }
 0xae6   :  { %v1735_v11 = vadd.f32 %v1731_v10, %v1661_v9 }
 0xae7   :  { %v2369_v12 = vpop.f32.mrf.mxu0 }
 0xae8   :  { %2447 = vtanh.f32 %v1735_v11 }
 0xaf5   :  { %v2448_v14 = vpop.eup %2447 }
 0xaf6   :  { %2379 = vmatmul.mubr.msk.f32.vlgmr.msra.gmra.mxu1 %vm371_vm4, %v2448_v14 }
 0xaf7   :  { %2393 = vmatpush3.msra.mxu1 %v2792_v13  ;;  %2400 = vmatprep.mubr.msk.f32.mxu1 %vm2547_vm0, %v2546_v0 }
 0xaf8   :  { %2394 = vmatprep.subr.mxu1 %v2546_v0 }
 0xaf9   :  { %2395 = vmatpush3.msra.mxu1 %v2796_v4  ;;  %v1813_v4 = vld [vmem:[#allocation2 + $0xc] sm:$0x3] }
 0xafa   :  { %2396 = vmatprep.subr.mxu1 %v2546_v0 }
 0xafb   :  { %2397 = vmatpush3.msra.mxu1 %v2802_v17 }
 0xafc   :  { %2398 = vmatprep.subr.mxu1 %v2546_v0 }
 0xafd   :  { %2399 = vmatpush3.msra.mxu1 %v2808_v18  ;;  %v1968_v18 = vld [vmem:[%s2951_s7 + $0x18] sm:$0xff]  ;;  %s2515_s7 = scalar_lea.vmem %s2058_s24, 32 }
 0xafe   :  { %p2516_p1 = scmp.ne.s32.totalorder %s2058_s24, %s2515_s7  ;;  %p2521_p3 = scmp.lt.s32.totalorder %s2515_s7, %s2515_s7 }
 0xb00   :  { %p2522_p4 = por %p2521_p3, %p2520_p2 }
 0xb02   :  { %p2523_p5 = pnand %p2522_p4, %p2516_p1 }
 0xbb6   :  { %v1807_v5 = vpop.f32.mrf.mxu1 }
 0xbb7   :  { %v1811_v7 = vadd.f32 %v1807_v5, %v1737_v16 }
 0xbb8   :  { %v2380_v19 = vpop.f32.mrf.mxu1 }
 0xbb9   :  { %2449 = vtanh.f32 %v1811_v7 }
 0xbc6   :  { %v2450_v13 = vpop.eup %2449 }
 0xbc7   :  { %2390 = vmatmul.mubr.msk.f32.vlgmr.msra.gmra.mxu0 %vm371_vm4, %v2450_v13 }
 0xbc8   :  { %2411 = vmatprep.mubr.msk.f32.mxu0 %vm2547_vm0, %v2546_v0  ;;  %2404 = vmatpush3.msra.mxu0 %v1968_v18 }
 0xbc9   :  { %2405 = vmatprep.subr.mxu0 %v2546_v0 }
 0xbca   :  { %2406 = vmatpush3.msra.mxu0 %v1967_v22 }
 0xbcb   :  { %2407 = vmatprep.subr.mxu0 %v2546_v0 }
 0xbcc   :  { %2408 = vmatpush3.msra.mxu0 %v1966_v23 }
 0xbcd   :  { %2409 = vmatprep.subr.mxu0 %v2546_v0 }
 0xbce   :  { %2410 = vmatpush3.msra.mxu0 %v1965_v24 }
 0xc87   :  { %v1883_v20 = vpop.f32.mrf.mxu0 }
 0xc88   :  { %v1887_v8 = vadd.f32 %v1883_v20, %v1813_v4 }
 0xc89   :  { %v2391_v21 = vpop.f32.mrf.mxu0 }
 0xc8a   :  { %2451 = vtanh.f32 %v1887_v8 }
 0xc97   :  { %v2452_v17 = vpop.eup %2451 }
 0xc98   :  { %2401 = vmatmul.mubr.msk.f32.vlgmr.msra.gmra.mxu1 %vm371_vm4, %v2452_v17 }
 0xd58   :  { %v1959_v26 = vpop.f32.mrf.mxu1 }
 0xd59   :  { %v1963_v27 = vadd.f32 %v1959_v26, %v1889_v25 }
 0xd5a   :  { %v2402_v28 = vpop.f32.mrf.mxu1 }
 0xd5b   :  { %2453 = vtanh.f32 %v1963_v27 }
 0xd68   :  { %v2454_v29 = vpop.eup %2453 }
 0xd69   :  { %2412 = vmatmul.mubr.msk.f32.vlgmr.msra.gmra.mxu0 %vm371_vm4, %v2454_v29 }
 0xe29   :  { %v2045_v31 = vpop.f32.mrf.mxu0 }
 0xe2a   :  { %v2046_v32 = vadd.f32 %v2088_v30, %v2045_v31 }
 0xe2b   :  { %v2413_v0 = vpop.f32.mrf.mxu0 }
 0xe2c   :  { %2050 = vst.msk [vmem:[#allocation10] sm:$0x3] %vm2049_vm12, %v2046_v32 }
 0xe2d   :  { %2526 = shalt.err (!%p2523_p5)
}
 0xe2e   :  { %2060 = dma.vmem_to_hbm [thread:$0]  %s2058_s24, 32, %s2953_s9, [#allocation6]  }
 0xe2f   :  { %2539 = dma.done.wait [#allocation6], 32  }
 0xe30   :  { %2540 = vsyncadd [#allocation6], 4294967264 }
 0xe31   :  { %2064 = vsyncpa [#allocation5], 1 }
 0xe32   :  { %2065 = vsyncpa [#allocation8], 1 }
 0xe33   :  { %2066 = vsyncpa [#allocation6], 1 }

</bundles_post_ra>
